<compile_context>
chip_gen: v5e
topology: v5e:2x2
jax: 0.10.0
libtpu: 0.0.40
codegen_flags: <defaults>
</compile_context>

<pallas_src>
import functools

import jax
import jax.numpy as jnp
from jax import lax
from jax.experimental import pallas as pl
from jax.experimental.pallas import tpu as pltpu


# ---------------------------------------------------------------------------
# helpers
# ---------------------------------------------------------------------------
def _round_up(x, m):
    return ((x + m - 1) // m) * m


def _tpu_vmem_bytes():
    """Physical VMEM per TensorCore (64 MiB on v7x, 128 MiB on v5e/v6e)."""
    try:
        info = pltpu.get_tpu_info()
        v = getattr(info, "vmem_capacity_bytes", None)
        if v:
            return int(v)
    except Exception:
        pass
    return 64 << 20  # conservative default works on every generation


def _vmem_limit(need_bytes, vmem_cap):
    """Scoped-VMEM request: working set * 1.5, generation-aware cap with
    headroom left for compiler-internal scratch (never the full 64 MiB)."""
    cap = min(vmem_cap - (8 << 20), 112 << 20)
    return int(min(max(need_bytes * 3 // 2 + (2 << 20), 32 << 20), cap))


def _plan_aggregation(n, vmem_cap):
    """(n_pad, tm, tk, kb) for the NxN aggregation.

    tm | n_pad and tk * kb == n_pad, so no block is ever ragged (Pallas OOB
    input blocks are undefined).  tk bounds the resident K-slab so VMEM use
    is independent of N; tk_cap is smaller on 64 MiB (v7x) parts.
    """
    big_vmem = vmem_cap > (96 << 20)        # v5e/v6e (128 MiB) vs v7x (64 MiB)
    tm_cap = 512
    tk_cap = 8192 if big_vmem else 4096
    if n <= tm_cap:
        n_pad = _round_up(n, 8)
        return n_pad, n_pad, n_pad, 1
    if n <= tk_cap:
        n_pad = _round_up(n, tm_cap)
        return n_pad, tm_cap, n_pad, 1
    kb = pl.cdiv(n, tk_cap)
    tk = _round_up(pl.cdiv(n, kb), tm_cap)  # multiple of tm -> divides n_pad
    return tk * kb, tm_cap, tk, kb


def _proj_row_tile(n_pad, f_in, f_aug):
    """Row tile for the projection (decoupled from the aggregation tile):
    large tiles amortize the per-grid-step overhead at negligible VMEM cost."""
    budget = 24 << 20
    for cand in (4096, 2048, 1024, 512):
        if (cand <= n_pad and n_pad % cand == 0
                and 4 * cand * (f_in + f_aug) + 4 * f_in * f_aug <= budget):
            return cand
    return n_pad if n_pad <= 512 else 512   # n_pad > 512 is a multiple of 512


# ---------------------------------------------------------------------------
# Kernel 1: fused-head projection  H_aug = [x @ W | 1]
# ---------------------------------------------------------------------------
def _project_kernel(x_ref, w_ref, o_ref):
    # w_ref carries a trailing all-zero column; overwrite that column with 1.0
    # so the aggregation's adj @ H_aug yields the row degree for free.
    h = jnp.dot(x_ref[...], w_ref[...], preferred_element_type=jnp.float32)
    col = lax.broadcasted_iota(jnp.int32, h.shape, 1)
    o_ref[...] = jnp.where(col == h.shape[1] - 1, 1.0, h).astype(o_ref.dtype)


def _project(x_bf, w_aug, *, vmem_cap):
    n_pad, f_in = x_bf.shape
    f_aug = w_aug.shape[1]
    tm = _proj_row_tile(n_pad, f_in, f_aug)
    need = 2 * (tm * f_in * 2 + f_in * f_aug * 2 + tm * f_aug * 2)
    return pl.pallas_call(
        _project_kernel,
        out_shape=jax.ShapeDtypeStruct((n_pad, f_aug), jnp.bfloat16),
        grid_spec=pltpu.PrefetchScalarGridSpec(
            num_scalar_prefetch=0,
            grid=(n_pad // tm,),
            in_specs=[pl.BlockSpec((tm, f_in), lambda i: (i, 0)),
                      pl.BlockSpec((f_in, f_aug), lambda i: (0, 0))],
            out_specs=pl.BlockSpec((tm, f_aug), lambda i: (i, 0))),
        compiler_params=pltpu.CompilerParams(
            dimension_semantics=("parallel",),
            vmem_limit_bytes=_vmem_limit(need, vmem_cap)),
        cost_estimate=pl.CostEstimate(
            flops=2 * n_pad * f_in * f_aug,
            transcendentals=0,
            bytes_accessed=2 * (n_pad * f_in + f_in * f_aug + n_pad * f_aug)),
    )(x_bf, w_aug)


# ---------------------------------------------------------------------------
# Kernel 2: aggregation  out = epilogue((adj @ H) / deg)   (K-tiled)
# ---------------------------------------------------------------------------
def _aggregate_kernel(adj_ref, h_ref, fb_ref, o_ref, acc_ref, *,
                      apply_elu, apply_log_softmax):
    k = pl.program_id(1)

    @pl.when(k == 0)
    def _():
        acc_ref[...] = jnp.zeros_like(acc_ref)

    # int8 {0,1} tile -> bf16 so adj @ H_aug runs on the native bf16 MXU path;
    # the adjacency is fed straight into the dot (no mask rebuild / select).
    adj = adj_ref[...].astype(jnp.bfloat16)
    acc_ref[...] += jnp.dot(adj, h_ref[...], preferred_element_type=jnp.float32)

    @pl.when(k == pl.num_programs(1) - 1)
    def _():
        f_out = fb_ref.shape[1]
        acc = acc_ref[...]
        hp = acc[:, :f_out]                    # sum of neighbour features
        deg = acc[:, f_out:f_out + 1]          # ones column of H_aug -> degree
        has_nbrs = deg > 0.5
        inv = pl.reciprocal(jnp.maximum(deg, 1.0), approx=True)
        # softmax of a j-constant logit is uniform: 1/deg over neighbours,
        # 1/N over all nodes (precomputed column mean) for isolated rows.
        h_prime = jnp.where(has_nbrs, hp * inv, fb_ref[...])
        if apply_elu:
            h_prime = jnp.where(h_prime > 0, h_prime,
                                jnp.exp(jnp.minimum(h_prime, 0.0)) - 1.0)
        if apply_log_softmax:
            z = h_prime - jnp.max(h_prime, axis=1, keepdims=True)
            h_prime = z - jnp.log(jnp.sum(jnp.exp(z), axis=1, keepdims=True))
        o_ref[...] = h_prime.astype(o_ref.dtype)


def _aggregate(adj_i8, h_aug, fallback, *, tm, tk, kb, vmem_cap,
               apply_elu, apply_log_softmax, out_dtype):
    n_pad = adj_i8.shape[0]
    f_aug = h_aug.shape[1]
    f_out = f_aug - 1
    out_b = jnp.dtype(out_dtype).itemsize
    kernel = functools.partial(_aggregate_kernel, apply_elu=apply_elu,
                               apply_log_softmax=apply_log_softmax)
    need = (2 * tm * tk                 # int8 adjacency tiles (double-buffered)
            + 2 * tk * f_aug * 2        # bf16 H_aug K-slabs
            + 2 * tm * f_out * out_b    # output tiles
            + tm * f_aug * 4            # f32 accumulator scratch
            + 2 * f_out * 4)            # fallback row
    return pl.pallas_call(
        kernel,
        out_shape=jax.ShapeDtypeStruct((n_pad, f_out), out_dtype),
        grid_spec=pltpu.PrefetchScalarGridSpec(
            num_scalar_prefetch=0,
            grid=(n_pad // tm, kb),
            in_specs=[pl.BlockSpec((tm, tk), lambda i, k: (i, k)),
                      pl.BlockSpec((tk, f_aug), lambda i, k: (k, 0)),
                      pl.BlockSpec((1, f_out), lambda i, k: (0, 0))],
            out_specs=pl.BlockSpec((tm, f_out), lambda i, k: (i, 0)),
            scratch_shapes=[pltpu.VMEM((tm, f_aug), jnp.float32)]),
        compiler_params=pltpu.CompilerParams(
            dimension_semantics=("parallel", "arbitrary"),
            vmem_limit_bytes=_vmem_limit(need, vmem_cap)),
        cost_estimate=pl.CostEstimate(
            flops=2 * n_pad * n_pad * f_aug,
            transcendentals=n_pad * f_out * (int(apply_elu)
                                             + int(apply_log_softmax)),
            bytes_accessed=(n_pad * n_pad + 2 * n_pad * f_aug
                            + out_b * n_pad * f_out)),
    )(adj_i8, h_aug, fallback)


# ---------------------------------------------------------------------------
# Layer / model wrappers
# ---------------------------------------------------------------------------
def _gat_layer(x_bf, w_aug, adj_i8, *, n_real, tm, tk, kb, vmem_cap,
               apply_elu, apply_log_softmax, out_dtype):
    h_aug = _project(x_bf, w_aug, vmem_cap=vmem_cap)
    f_out = w_aug.shape[1] - 1
    # Column mean of the (real) projected features: the exact value the
    # reference softmax assigns to rows with no neighbours (uniform 1/N).
    fallback = (jnp.sum(h_aug[:n_real, :f_out].astype(jnp.float32),
                        axis=0, keepdims=True) / jnp.float32(n_real))
    return _aggregate(adj_i8, h_aug, fallback, tm=tm, tk=tk, kb=kb,
                      vmem_cap=vmem_cap, apply_elu=apply_elu,
                      apply_log_softmax=apply_log_softmax, out_dtype=out_dtype)


def _xavier_uniform(key, shape, gain=1.414):
    fan_in, fan_out = shape[0], shape[1]
    limit = gain * jnp.sqrt(6.0 / (fan_in + fan_out))
    return jax.random.uniform(key, shape, jnp.float32, -limit, limit)


def init_gat_params(key, nfeat, nhid, nclass, nheads):
    params = {"heads": [], "out": None}
    keys = jax.random.split(key, 2 * nheads + 2)
    for i in range(nheads):
        w = _xavier_uniform(keys[2 * i], (nfeat, nhid))
        a = _xavier_uniform(keys[2 * i + 1], (2 * nhid, 1))
        params["heads"].append((w, a))
    w_out = _xavier_uniform(keys[-2], (nhid * nheads, nclass))
    a_out = _xavier_uniform(keys[-1], (2 * nclass, 1))
    params["out"] = (w_out, a_out)
    return params


def gat_forward(x, adj, params, *, alpha=0.2):
    # TODO(synk): dropout layers are identity (inference semantics); training
    # mode stochastic dropout is not reproduced.
    # `alpha`/LeakyReLU and the attention vectors `a` are mathematically inert
    # in the reference forward (the repeat/view construction makes the logit
    # constant along j), so they are elided from the kernels.
    del alpha
    n = x.shape[0]
    vmem_cap = _tpu_vmem_bytes()
    n_pad, tm, tk, kb = _plan_aggregation(n, vmem_cap)
    pad_n = n_pad - n

    # int8 {0,1} adjacency: converted/padded once, shared by both layers.
    adj_i8 = jnp.pad((adj > 0).astype(jnp.int8), ((0, pad_n), (0, pad_n)))
    x_bf = jnp.pad(x.astype(jnp.bfloat16), ((0, pad_n), (0, 0)))

    def aug(w):  # bf16 weights + trailing zero column (becomes the degree col)
        return jnp.pad(w.astype(jnp.bfloat16), ((0, 0), (0, 1)))

    # All heads share the same (uniform 1/deg) attention -> fuse the heads
    # into one projection by concatenating head weights along the output axis.
    w_all = aug(jnp.concatenate([w for (w, _a) in params["heads"]], axis=1))
    h1 = _gat_layer(x_bf, w_all, adj_i8, n_real=n, tm=tm, tk=tk, kb=kb,
                    vmem_cap=vmem_cap, apply_elu=True,
                    apply_log_softmax=False, out_dtype=jnp.bfloat16)

    w_out = aug(params["out"][0])
    out = _gat_layer(h1, w_out, adj_i8, n_real=n, tm=tm, tk=tk, kb=kb,
                     vmem_cap=vmem_cap, apply_elu=True,
                     apply_log_softmax=True, out_dtype=jnp.float32)
    return out[:n]


# ---------------------------------------------------------------------------
# Pure-JAX transcription of the original PyTorch forward (for validation)
# ---------------------------------------------------------------------------
def _reference_forward(x, adj, params, *, alpha):
    def layer(xin, w, a, concat):
        h = xin @ w
        f_out = w.shape[1]
        # a_input[i, j] = concat(h_i, h_i)  (faithful to the repeat/view bug)
        s = h @ a[:f_out, 0] + h @ a[f_out:, 0]            # (N,)
        e = jnp.where(s > 0, s, alpha * s)                 # LeakyReLU(alpha)
        logits = jnp.where(adj > 0, e[:, None], -9e15)
        att = jax.nn.softmax(logits, axis=1)
        hp = att @ h
        return jax.nn.elu(hp) if concat else hp

    heads = [layer(x, w, a, True) for (w, a) in params["heads"]]
    xh = jnp.concatenate(heads, axis=1)
    w_out, a_out = params["out"]
    out = jax.nn.elu(layer(xh, w_out, a_out, False))
    return jax.nn.log_softmax(out, axis=1)


# ---------------------------------------------------------------------------
if __name__ == "__main__":
    def run_case(key, n, nfeat, nhid, nclass, nheads, isolate=0):
        kx, kadj, kp = jax.random.split(key, 3)
        x = jax.random.normal(kx, (n, nfeat), jnp.float32)
        adj = (jax.random.uniform(kadj, (n, n)) > 0.6).astype(jnp.float32)
        adj = jnp.maximum(adj, jnp.eye(n, dtype=jnp.float32))
        if isolate:
            adj = adj.at[:isolate, :].set(0.0)   # zero-degree rows -> fallback
        params = init_gat_params(kp, nfeat, nhid, nclass, nheads)

        out = jax.block_until_ready(gat_forward(x, adj, params, alpha=0.2))
        assert out.shape == (n, nclass)
        assert bool(jnp.all(jnp.isfinite(out)))

        # Compare against the pure-JAX transcription of the PyTorch forward,
        # evaluated on bf16-rounded inputs/weights (the kernel's dtype policy).
        rnd = lambda t: t.astype(jnp.bfloat16).astype(jnp.float32)
        ref_params = {"heads": [(rnd(w), a) for (w, a) in params["heads"]],
                      "out": (rnd(params["out"][0]), params["out"][1])}
        ref = _reference_forward(rnd(x), adj, ref_params, alpha=0.2)
        err = float(jnp.max(jnp.abs(out - ref)))
        assert bool(jnp.allclose(out, ref, atol=1e-1, rtol=1e-1)), err

    key = jax.random.PRNGKey(0)
    k1, k2 = jax.random.split(key)
    run_case(k1, n=8, nfeat=16, nhid=8, nclass=4, nheads=4)
    # larger graph with isolated nodes exercises padding and the 1/N fallback
    run_case(k2, n=200, nfeat=48, nhid=16, nclass=7, nheads=4, isolate=3)
    print("KERNEL_OK")
</pallas_src>

<mosaic_0001>
module attributes {stable_mosaic.version = 11 : i64} {
  func.func @_project_kernel(%arg0: i32, %arg1: memref<8x16xbf16, #tpu.memory_space<vmem>>, %arg2: memref<16x33xbf16, #tpu.memory_space<vmem>>, %arg3: memref<8x33xbf16, #tpu.memory_space<vmem>>) attributes {dimension_semantics = [#tpu.dimension_semantics<parallel>], iteration_bounds = array<i64: 1>, scalar_prefetch = 0 : i64, scratch_operands = 0 : i64, tpu.core_type = #tpu.core_type<tc>, window_params = [{transform_indices = @transform_0, window_bounds = array<i64: 8, 16>}, {pipeline_mode = #tpu.pipeline_mode<synchronous>, transform_indices = @transform_1, window_bounds = array<i64: 16, 33>}, {transform_indices = @transform_2, window_bounds = array<i64: 8, 33>}]} {
    %c0 = arith.constant 0 : index
    %c0_0 = arith.constant 0 : index
    %0 = vector.load %arg1[%c0, %c0_0] : memref<8x16xbf16, #tpu.memory_space<vmem>>, vector<8x16xbf16>
    %c0_1 = arith.constant 0 : index
    %c0_2 = arith.constant 0 : index
    %1 = vector.load %arg2[%c0_1, %c0_2] : memref<16x33xbf16, #tpu.memory_space<vmem>>, vector<16x33xbf16>
    %cst = arith.constant dense<0.000000e+00> : vector<8x33xf32>
    %2 = tpu.matmul %0, %1, %cst {dimension_numbers = #tpu.dot_dimension_numbers<[1], [0], [0], [1], [0, 0, 1, 1], [], []>} : vector<8x16xbf16>, vector<16x33xbf16>, vector<8x33xf32> -> vector<8x33xf32>
    %3 = tpu.iota {dimensions = array<i32: 1>} : vector<8x33xi32>
    %c32_i32 = arith.constant 32 : i32
    %4 = vector.broadcast %c32_i32 : i32 to vector<8x33xi32>
    %5 = arith.cmpi eq, %3, %4 : vector<8x33xi32>
    %cst_3 = arith.constant 1.000000e+00 : f32
    %6 = vector.broadcast %cst_3 : f32 to vector<8x33xf32>
    %7 = arith.select %5, %6, %2 : vector<8x33xi1>, vector<8x33xf32>
    %8 = arith.truncf %7 : vector<8x33xf32> to vector<8x33xbf16>
    %c0_4 = arith.constant 0 : index
    %c0_5 = arith.constant 0 : index
    %9 = vector.load %arg3[%c0_4, %c0_5] : memref<8x33xbf16, #tpu.memory_space<vmem>>, vector<8x33xbf16>
    tpu.vector_store %arg3[%c0_4, %c0_5], %8 {strides = array<i32>} : memref<8x33xbf16, #tpu.memory_space<vmem>>, vector<8x33xbf16>,
    return
  }
  func.func @transform_0(%arg0: i32) -> (i32, i32) {
    %c0_i32 = arith.constant 0 : i32
    %c0_i32_0 = arith.constant 0 : i32
    return %arg0, %c0_i32 : i32, i32
  }
  func.func @transform_1(%arg0: i32) -> (i32, i32) {
    %c0_i32 = arith.constant 0 : i32
    %c0_i32_0 = arith.constant 0 : i32
    %c0_i32_1 = arith.constant 0 : i32
    return %c0_i32, %c0_i32_0 : i32, i32
  }
  func.func @transform_2(%arg0: i32) -> (i32, i32) {
    %c0_i32 = arith.constant 0 : i32
    %c0_i32_0 = arith.constant 0 : i32
    return %arg0, %c0_i32 : i32, i32
  }
}

</mosaic_0001>

<bundles_post_ra>
// kernel: tpu_custom_call.1
= control target key start
LH: loop header
LB: loop body
LE: loop exit
PB: predicated region body
PF: predicated region fallthrough
CT: control target
= control target key end

     0   :  { %7 = vsyncpa [#allocation3], 0  ;;  %s212_s0 = inlined_call_operand.hbm [shape: bf16[8,16], index: 0, kind: input, shape index: {}]   ;;  %s213_s1 = inlined_call_operand.hbm [shape: bf16[16,33], index: 1, kind: input, shape index: {}]   ;;  %s214_s2 = inlined_call_operand.hbm [shape: bf16[8,33], index: 2, kind: output, shape index: {}]  }
   0x1   :  { %8 = vsyncpa [#allocation6], 0 }
   0x2   :  { %9 = vsyncpa [#allocation4], 0  ;;  %s15_s11 = sshll.u32 %s212_s0, 4  ;;  %s183_s12 = smov [#allocation2]   ;;  %s16_s11 = int_to_ptr.hbm [resolvable:$true] %s15_s11 }
   0x3   :  { %s17_s13 = sshll.u32 %s183_s12, 4  ;;  %s25_s16 = sshll.u32 %s213_s1, 4  ;;  %s18_s13 = int_to_ptr.vmem [resolvable:$true] %s17_s13  ;;  %s26_s16 = int_to_ptr.hbm [resolvable:$true] %s25_s16 }
   0x4   :  { %20 = dma.hbm_to_vmem [thread:$0]  %s16_s11, 64, %s18_s13, [#allocation3]  }
   0x5   :  { %s184_s17 = smov [#allocation5]   ;;  %s185_s19 = smov 64  }
   0x6   :  { %s27_s18 = sshll.u32 %s184_s17, 4  ;;  %s186_s20 = smov 4   ;;  %s28_s18 = int_to_ptr.vmem [resolvable:$true] %s27_s18 }
   0x7   :  { %33 = dma.hbm_to_vmem [thread:$0]  %s26_s16, 128, %s28_s18, [#allocation6], %s185_s19, %s185_s19, %s186_s20  }
   0x8   :  { %177 = dma.done.wait [#allocation3], 64  }
   0x9   :  { %178 = vsyncadd [#allocation3], 4294967232 }
   0xa   :  { %179 = dma.done.wait [#allocation6], 128  }
   0xb   :  { %180 = vsyncadd [#allocation6], 4294967168  ;;  %v99_v0 = vld [vmem:[#allocation5] sm:$0xff]  ;;  %v43_v1 = vld [vmem:[#allocation2] sm:$0xf]  ;;  %vm52_vm0 = vcmask 130048   ;;  %v69_v2 = vlaneseq }
   0xc   :  { %63 = vmatpush.bf16.msra.mxu0 %v99_v0  ;;  %s187_s0 = smov [#allocation7]   ;;  %s83_s23 = sshll.u32 %s214_s2, 4  ;;  %vm74_vm2 = vcmask 265216   ;;  %s84_s23 = int_to_ptr.hbm [resolvable:$true] %s83_s23 }
   0xd   :  { %v70_v3 = vand.u32 127, %v69_v2  ;;  %s81_s1 = sshll.u32 %s187_s0, 4  ;;  %s82_s1 = int_to_ptr.vmem [resolvable:$true] %s81_s1 }
   0xf   :  { %98 = vmatmul.msk.bf16.vlgmr.msra.gmra.mxu0 %vm52_vm0, %v43_v1  ;;  %vm71_vm1 = vcmp.eq.s32.totalorder %v70_v3, 32 }
  0x8c   :  { %v65_v4 = vpop.f32.mrf.mxu0 }
  0x8d   :  { %v72_v5 = vsel %vm71_vm1, 1.0, %v65_v4 }
  0x8e   :  { %v73_v6 = vpack.c.bf16 %v72_v5, %v72_v5 }
  0x90   :  { %75 = vst.msk [vmem:[#allocation7] sm:$0xf] %vm74_vm2, %v73_v6 }
  0x91   :  { %86 = dma.vmem_to_hbm [thread:$0]  %s82_s1, 64, %s84_s23, [#allocation4]  }
  0x94   :  { %v67_v7 = vpop.f32.mrf.mxu0 }
  0x95   :  { %181 = dma.done.wait [#allocation4], 64  }
  0x96   :  { %182 = vsyncadd [#allocation4], 4294967232 }
  0x97   :  { %91 = vsyncpa [#allocation3], 1 }
  0x98   :  { %92 = vsyncpa [#allocation6], 1 }
  0x99   :  { %93 = vsyncpa [#allocation4], 1 }

</bundles_post_ra>
